<compile_context>
chip_gen: v6e
topology: v6e:2x2x1
jax: 0.10.0
libtpu: 0.0.40
codegen_flags: <defaults>
</compile_context>

<pallas_src>
import math
import jax
import jax.numpy as jnp
from jax.experimental import pallas as pl
from jax.experimental.pallas import tpu as pltpu


def _round_up(x, m):
    return ((x + m - 1) // m) * m


def _pick_tile(dim, candidates):
    """Largest tile from `candidates` (descending) such that padding `dim` up
    to a multiple of it wastes <= ~12.5% extra bytes (the weight streams are
    the critical HBM resource). Returns (tile, padded_dim)."""
    base = _round_up(dim, 128)
    for t in candidates:
        if t < 128 or t > base:
            continue
        padded = _round_up(base, t)
        if (padded - base) * 8 <= base:
            return t, padded
    return 128, base


# ----------------------------- kernels ------------------------------------- #

def _lgnj_train_kernel(xz_ref, wmu_ref, wvar_ref, bmu_ref, bvar_ref, eps_ref,
                       out_ref, acc_var):
    k = pl.program_id(2)

    @pl.when(k == 0)
    def _():
        out_ref[...] = jnp.zeros_like(out_ref)      # mu accumulates in-place
        acc_var[...] = jnp.zeros_like(acc_var)

    # Elementwise math in f32 (v5e has no bf16 VPU); MXU operands in bf16.
    xz = xz_ref[...]
    xz_bf = xz.astype(jnp.bfloat16)
    xz2_bf = (xz * xz).astype(jnp.bfloat16)

    out_ref[...] += jnp.dot(xz_bf, wmu_ref[...], preferred_element_type=jnp.float32)
    acc_var[...] += jnp.dot(xz2_bf, wvar_ref[...], preferred_element_type=jnp.float32)

    @pl.when(k == pl.num_programs(2) - 1)
    def _():
        mu = out_ref[...] + bmu_ref[...]
        var = acc_var[...] + bvar_ref[...]          # bvar = exp(bias_logvar)
        # reparametrize(mu, log(var)): std = exp(0.5*log(var)) = sqrt(var)
        out_ref[...] = mu + eps_ref[...] * jnp.sqrt(var)


def _lgnj_eval_kernel(xz_ref, wmu_ref, bmu_ref, out_ref):
    k = pl.program_id(2)

    @pl.when(k == 0)
    def _():
        out_ref[...] = jnp.zeros_like(out_ref)

    out_ref[...] += jnp.dot(xz_ref[...].astype(jnp.bfloat16), wmu_ref[...],
                            preferred_element_type=jnp.float32)

    @pl.when(k == pl.num_programs(2) - 1)
    def _():
        out_ref[...] += bmu_ref[...]


# ----------------------------- wrapper -------------------------------------- #

def prepare_params(weight_mu, weight_logvar, bias_mu, bias_logvar):
    """One-time parameter prep (outside the forward hot path):
    transpose weights to (In, Out), pad lane-dense, precompute exp() of the
    logvars in f32, and cast the MXU weight streams to bf16."""
    Out, In = weight_mu.shape
    tk, In_p = _pick_tile(In, (1024, 512, 256, 128))
    tn, Out_p = _pick_tile(Out, (512, 256, 128))

    wmu_t = jnp.zeros((In_p, Out_p), jnp.bfloat16)
    wmu_t = wmu_t.at[:In, :Out].set(weight_mu.T.astype(jnp.bfloat16))

    # exp(weight_logvar) computed once here in f32 (no per-tile EUP exp in the
    # kernel, and no bf16-before-exp quantization blow-up); the exp *result*
    # is what gets cast to bf16 for the MXU. Padded entries stay 0.
    wvar_t = jnp.zeros((In_p, Out_p), jnp.bfloat16)
    wvar_t = wvar_t.at[:In, :Out].set(
        jnp.exp(weight_logvar.astype(jnp.float32)).T.astype(jnp.bfloat16))

    bmu = jnp.zeros((1, Out_p), jnp.float32).at[0, :Out].set(bias_mu.astype(jnp.float32))
    # exp(bias_logvar) precomputed in f32; padded columns are 0 -> var=0 there,
    # sqrt(0)=0 is well-defined and the columns are sliced off before return.
    bvar = jnp.zeros((1, Out_p), jnp.float32).at[0, :Out].set(
        jnp.exp(bias_logvar.astype(jnp.float32)))

    return dict(wmu_t=wmu_t, wvar_t=wvar_t, bmu=bmu, bvar=bvar,
                in_features=In, out_features=Out, tk=tk, tn=tn)


def linear_group_nj_forward(x, z, params, eps_out=None, *, training=True):
    """x, z: (B, In) f32.  eps_out: (B, Out) f32 (training only).
    params: output of prepare_params()."""
    In, Out = params["in_features"], params["out_features"]
    tk, tn = params["tk"], params["tn"]
    wmu_t = params["wmu_t"]
    In_p, Out_p = wmu_t.shape

    B = x.shape[0]
    tm = 256 if B > 256 else _round_up(max(B, 8), 8)
    B_p = _round_up(B, tm)

    # Single fused activation stream (removes the duplicate z input that was
    # re-DMA'd from HBM for every Out tile). xz stays f32 so xz^2 is accurate.
    xz = x.astype(jnp.float32) * z.astype(jnp.float32)
    xzp = jnp.zeros((B_p, In_p), jnp.float32).at[:B, :In].set(xz)

    grid = (B_p // tm, Out_p // tn, In_p // tk)      # (M, Out, K); K innermost

    xz_spec = pl.BlockSpec((tm, tk), lambda m, j, k: (m, k))
    w_spec = pl.BlockSpec((tk, tn), lambda m, j, k: (k, j))
    b_spec = pl.BlockSpec((1, tn), lambda m, j, k: (0, j))
    mo_spec = pl.BlockSpec((tm, tn), lambda m, j, k: (m, j))

    cp = pltpu.CompilerParams(
        dimension_semantics=("parallel", "parallel", "arbitrary"),
        vmem_limit_bytes=32 * 1024 * 1024)

    if training:
        ep = jnp.zeros((B_p, Out_p), jnp.float32).at[:B, :Out].set(
            eps_out.astype(jnp.float32))
        out_p = pl.pallas_call(
            _lgnj_train_kernel,
            out_shape=jax.ShapeDtypeStruct((B_p, Out_p), jnp.float32),
            grid=grid,
            in_specs=[xz_spec, w_spec, w_spec, b_spec, b_spec, mo_spec],
            out_specs=mo_spec,
            scratch_shapes=[pltpu.VMEM((tm, tn), jnp.float32)],
            compiler_params=cp,
        )(xzp, wmu_t, params["wvar_t"], params["bmu"], params["bvar"], ep)
    else:
        out_p = pl.pallas_call(
            _lgnj_eval_kernel,
            out_shape=jax.ShapeDtypeStruct((B_p, Out_p), jnp.float32),
            grid=grid,
            in_specs=[xz_spec, w_spec, b_spec],
            out_specs=mo_spec,
            compiler_params=cp,
        )(xzp, wmu_t, params["bmu"])

    return out_p[:B, :Out]


# ----------------------------- reference ------------------------------------ #

def reference_forward(x, z, weight_mu, weight_logvar, bias_mu, bias_logvar, eps_out):
    xz = x * z
    mu = xz @ weight_mu.T + bias_mu
    var = (xz ** 2) @ jnp.exp(weight_logvar).T + jnp.exp(bias_logvar)
    return mu + eps_out * jnp.exp(0.5 * jnp.log(var))


def _run_case(key, B, In, Out, tol):
    (k_zmu, k_zlv, k_wmu, k_wlv, k_blv,
     k_x, k_epsz, k_epso) = jax.random.split(key, 8)

    # Deterministic parameter init mirroring reset_parameters():
    stdv = 1.0 / math.sqrt(In)
    z_mu = 1.0 + 0.01 * jax.random.normal(k_zmu, (In,), jnp.float32)
    z_logvar = -9.0 + 0.01 * jax.random.normal(k_zlv, (In,), jnp.float32)
    weight_mu = stdv * jax.random.normal(k_wmu, (Out, In), jnp.float32)
    weight_logvar = -9.0 + 0.01 * jax.random.normal(k_wlv, (Out, In), jnp.float32)
    bias_mu = jnp.zeros((Out,), jnp.float32)
    bias_logvar = -9.0 + 0.01 * jax.random.normal(k_blv, (Out,), jnp.float32)

    x = jax.random.normal(k_x, (B, In), jnp.float32)

    # One-time parameter prep (transpose + pad + exp + bf16 cast).
    params = prepare_params(weight_mu, weight_logvar, bias_mu, bias_logvar)

    # ---- training / stochastic path --------------------------------------- #
    # z = reparametrize(z_mu.repeat(B,1), z_logvar.repeat(B,1), sampling=True)
    eps_z = jax.random.normal(k_epsz, (B, In), jnp.float32)
    z = z_mu[None, :] + eps_z * jnp.exp(0.5 * z_logvar)[None, :]
    eps_out = jax.random.normal(k_epso, (B, Out), jnp.float32)

    out_train = jax.block_until_ready(
        linear_group_nj_forward(x, z, params, eps_out, training=True))
    ref_train = reference_forward(x, z, weight_mu, weight_logvar,
                                  bias_mu, bias_logvar, eps_out)
    assert out_train.shape == (B, Out)
    # bf16 MXU operands vs f32 reference -> allow percent-level numeric slack.
    assert jnp.allclose(out_train, ref_train, atol=tol, rtol=tol), \
        f"training-path mismatch vs reference (B={B}, In={In}, Out={Out})"

    # ---- eval / non-sampling path (z = z_mu, out = mu only) ---------------- #
    z_eval = jnp.broadcast_to(z_mu[None, :], (B, In))
    out_eval = jax.block_until_ready(
        linear_group_nj_forward(x, z_eval, params, None, training=False))
    ref_eval = (x * z_eval) @ weight_mu.T + bias_mu
    assert jnp.allclose(out_eval, ref_eval, atol=tol, rtol=tol), \
        f"eval-path mismatch vs reference (B={B}, In={In}, Out={Out})"


if __name__ == "__main__":
    # Small demo shapes consistent with the module (grid collapses to (1,1,1)).
    _run_case(jax.random.PRNGKey(0), B=8, In=32, Out=64, tol=3e-2)

    # Multi-tile case: B not a multiple of 8, several M/Out/K tiles -> exercises
    # the pl.when init/finalize logic, K accumulation and batch tiling.
    _run_case(jax.random.PRNGKey(1), B=300, In=1536, Out=768, tol=4e-2)

    print("KERNEL_OK")
</pallas_src>

<mosaic_0001>
module attributes {stable_mosaic.version = 11 : i64} {
  func.func @_lgnj_train_kernel(%arg0: i32, %arg1: i32, %arg2: i32, %arg3: memref<8x128xf32, #tpu.memory_space<vmem>>, %arg4: memref<128x128xbf16, #tpu.memory_space<vmem>>, %arg5: memref<128x128xbf16, #tpu.memory_space<vmem>>, %arg6: memref<1x128xf32, #tpu.memory_space<vmem>>, %arg7: memref<1x128xf32, #tpu.memory_space<vmem>>, %arg8: memref<8x128xf32, #tpu.memory_space<vmem>>, %arg9: memref<8x128xf32, #tpu.memory_space<vmem>>, %arg10: memref<8x128xf32, #tpu.memory_space<vmem>>) attributes {dimension_semantics = [#tpu.dimension_semantics<parallel>, #tpu.dimension_semantics<parallel>, #tpu.dimension_semantics<arbitrary>], iteration_bounds = array<i64: 1, 1, 1>, scalar_prefetch = 0 : i64, scratch_operands = 1 : i64, tpu.core_type = #tpu.core_type<tc>, window_params = [{transform_indices = @transform_0, window_bounds = array<i64: 8, 128>}, {transform_indices = @transform_1, window_bounds = array<i64: 128, 128>}, {transform_indices = @transform_2, window_bounds = array<i64: 128, 128>}, {transform_indices = @transform_3, window_bounds = array<i64: 1, 128>}, {transform_indices = @transform_4, window_bounds = array<i64: 1, 128>}, {transform_indices = @transform_5, window_bounds = array<i64: 8, 128>}, {transform_indices = @transform_6, window_bounds = array<i64: 8, 128>}]} {
    %c0_i32 = arith.constant 0 : i32
    %0 = arith.cmpi eq, %arg2, %c0_i32 : i32
    %1 = arith.extui %0 : i1 to i32
    %c0_i32_0 = arith.constant 0 : i32
    %2 = arith.cmpi ne, %1, %c0_i32_0 : i32
    scf.if %2 {
      %cst_17 = arith.constant 0.000000e+00 : f32
      %20 = vector.broadcast %cst_17 : f32 to vector<8x128xf32>
      %c0_18 = arith.constant 0 : index
      %c0_19 = arith.constant 0 : index
      %21 = vector.load %arg9[%c0_18, %c0_19] : memref<8x128xf32, #tpu.memory_space<vmem>>, vector<8x128xf32>
      tpu.vector_store %arg9[%c0_18, %c0_19], %20 {strides = array<i32>} : memref<8x128xf32, #tpu.memory_space<vmem>>, vector<8x128xf32>,
      %cst_20 = arith.constant 0.000000e+00 : f32
      %22 = vector.broadcast %cst_20 : f32 to vector<8x128xf32>
      %c0_21 = arith.constant 0 : index
      %c0_22 = arith.constant 0 : index
      %23 = vector.load %arg10[%c0_21, %c0_22] : memref<8x128xf32, #tpu.memory_space<vmem>>, vector<8x128xf32>
      tpu.vector_store %arg10[%c0_21, %c0_22], %22 {strides = array<i32>} : memref<8x128xf32, #tpu.memory_space<vmem>>, vector<8x128xf32>,
    } else {
    }
    %c0 = arith.constant 0 : index
    %c0_1 = arith.constant 0 : index
    %3 = vector.load %arg3[%c0, %c0_1] : memref<8x128xf32, #tpu.memory_space<vmem>>, vector<8x128xf32>
    %4 = arith.truncf %3 : vector<8x128xf32> to vector<8x128xbf16>
    %5 = arith.mulf %3, %3 : vector<8x128xf32>
    %6 = arith.truncf %5 : vector<8x128xf32> to vector<8x128xbf16>
    %c0_2 = arith.constant 0 : index
    %c0_3 = arith.constant 0 : index
    %7 = vector.load %arg9[%c0_2, %c0_3] : memref<8x128xf32, #tpu.memory_space<vmem>>, vector<8x128xf32>
    %c0_4 = arith.constant 0 : index
    %c0_5 = arith.constant 0 : index
    %8 = vector.load %arg4[%c0_4, %c0_5] : memref<128x128xbf16, #tpu.memory_space<vmem>>, vector<128x128xbf16>
    %cst = arith.constant dense<0.000000e+00> : vector<8x128xf32>
    %9 = tpu.matmul %4, %8, %cst {dimension_numbers = #tpu.dot_dimension_numbers<[1], [0], [0], [1], [0, 0, 1, 1], [], []>} : vector<8x128xbf16>, vector<128x128xbf16>, vector<8x128xf32> -> vector<8x128xf32>
    %10 = arith.addf %7, %9 : vector<8x128xf32>
    %c0_6 = arith.constant 0 : index
    %c0_7 = arith.constant 0 : index
    %11 = vector.load %arg9[%c0_6, %c0_7] : memref<8x128xf32, #tpu.memory_space<vmem>>, vector<8x128xf32>
    tpu.vector_store %arg9[%c0_6, %c0_7], %10 {strides = array<i32>} : memref<8x128xf32, #tpu.memory_space<vmem>>, vector<8x128xf32>,
    %c0_8 = arith.constant 0 : index
    %c0_9 = arith.constant 0 : index
    %12 = vector.load %arg10[%c0_8, %c0_9] : memref<8x128xf32, #tpu.memory_space<vmem>>, vector<8x128xf32>
    %c0_10 = arith.constant 0 : index
    %c0_11 = arith.constant 0 : index
    %13 = vector.load %arg5[%c0_10, %c0_11] : memref<128x128xbf16, #tpu.memory_space<vmem>>, vector<128x128xbf16>
    %cst_12 = arith.constant dense<0.000000e+00> : vector<8x128xf32>
    %14 = tpu.matmul %6, %13, %cst_12 {dimension_numbers = #tpu.dot_dimension_numbers<[1], [0], [0], [1], [0, 0, 1, 1], [], []>} : vector<8x128xbf16>, vector<128x128xbf16>, vector<8x128xf32> -> vector<8x128xf32>
    %15 = arith.addf %12, %14 : vector<8x128xf32>
    %c0_13 = arith.constant 0 : index
    %c0_14 = arith.constant 0 : index
    %16 = vector.load %arg10[%c0_13, %c0_14] : memref<8x128xf32, #tpu.memory_space<vmem>>, vector<8x128xf32>
    tpu.vector_store %arg10[%c0_13, %c0_14], %15 {strides = array<i32>} : memref<8x128xf32, #tpu.memory_space<vmem>>, vector<8x128xf32>,
    %c0_i32_15 = arith.constant 0 : i32
    %17 = arith.cmpi eq, %arg2, %c0_i32_15 : i32
    %18 = arith.extui %17 : i1 to i32
    %c0_i32_16 = arith.constant 0 : i32
    %19 = arith.cmpi ne, %18, %c0_i32_16 : i32
    scf.if %19 {
      %c0_17 = arith.constant 0 : index
      %c0_18 = arith.constant 0 : index
      %20 = vector.load %arg9[%c0_17, %c0_18] : memref<8x128xf32, #tpu.memory_space<vmem>>, vector<8x128xf32>
      %c0_19 = arith.constant 0 : index
      %c0_20 = arith.constant 0 : index
      %21 = vector.load %arg6[%c0_19, %c0_20] : memref<1x128xf32, #tpu.memory_space<vmem>>, vector<1x128xf32>
      %22 = vector.broadcast %21 : vector<1x128xf32> to vector<8x128xf32>
      %23 = arith.addf %20, %22 : vector<8x128xf32>
      %c0_21 = arith.constant 0 : index
      %c0_22 = arith.constant 0 : index
      %24 = vector.load %arg10[%c0_21, %c0_22] : memref<8x128xf32, #tpu.memory_space<vmem>>, vector<8x128xf32>
      %c0_23 = arith.constant 0 : index
      %c0_24 = arith.constant 0 : index
      %25 = vector.load %arg7[%c0_23, %c0_24] : memref<1x128xf32, #tpu.memory_space<vmem>>, vector<1x128xf32>
      %26 = vector.broadcast %25 : vector<1x128xf32> to vector<8x128xf32>
      %27 = arith.addf %24, %26 : vector<8x128xf32>
      %c0_25 = arith.constant 0 : index
      %c0_26 = arith.constant 0 : index
      %28 = vector.load %arg8[%c0_25, %c0_26] : memref<8x128xf32, #tpu.memory_space<vmem>>, vector<8x128xf32>
      %29 = math.sqrt %27 : vector<8x128xf32>
      %30 = arith.mulf %28, %29 : vector<8x128xf32>
      %31 = arith.addf %23, %30 : vector<8x128xf32>
      %c0_27 = arith.constant 0 : index
      %c0_28 = arith.constant 0 : index
      %32 = vector.load %arg9[%c0_27, %c0_28] : memref<8x128xf32, #tpu.memory_space<vmem>>, vector<8x128xf32>
      tpu.vector_store %arg9[%c0_27, %c0_28], %31 {strides = array<i32>} : memref<8x128xf32, #tpu.memory_space<vmem>>, vector<8x128xf32>,
    } else {
    }
    return
  }
  func.func @transform_0(%arg0: i32, %arg1: i32, %arg2: i32) -> (i32, i32) {
    %c0_i32 = arith.constant 0 : i32
    return %arg0, %arg2 : i32, i32
  }
  func.func @transform_1(%arg0: i32, %arg1: i32, %arg2: i32) -> (i32, i32) {
    %c0_i32 = arith.constant 0 : i32
    return %arg2, %arg1 : i32, i32
  }
  func.func @transform_2(%arg0: i32, %arg1: i32, %arg2: i32) -> (i32, i32) {
    %c0_i32 = arith.constant 0 : i32
    return %arg2, %arg1 : i32, i32
  }
  func.func @transform_3(%arg0: i32, %arg1: i32, %arg2: i32) -> (i32, i32) {
    %c0_i32 = arith.constant 0 : i32
    %c0_i32_0 = arith.constant 0 : i32
    return %c0_i32, %arg1 : i32, i32
  }
  func.func @transform_4(%arg0: i32, %arg1: i32, %arg2: i32) -> (i32, i32) {
    %c0_i32 = arith.constant 0 : i32
    %c0_i32_0 = arith.constant 0 : i32
    return %c0_i32, %arg1 : i32, i32
  }
  func.func @transform_5(%arg0: i32, %arg1: i32, %arg2: i32) -> (i32, i32) {
    %c0_i32 = arith.constant 0 : i32
    return %arg0, %arg1 : i32, i32
  }
  func.func @transform_6(%arg0: i32, %arg1: i32, %arg2: i32) -> (i32, i32) {
    %c0_i32 = arith.constant 0 : i32
    return %arg0, %arg1 : i32, i32
  }
}

</mosaic_0001>

<bundles_post_ra>
// kernel: tpu_custom_call.1
= control target key start
LH: loop header
LB: loop body
LE: loop exit
PB: predicated region body
PF: predicated region fallthrough
CT: control target
= control target key end

     0   :  { %11 = vsyncpa [#allocation4], 0  ;;  %s625_s0 = inlined_call_operand.hbm [shape: f32[8,128], index: 0, kind: input, shape index: {}]   ;;  %s626_s1 = inlined_call_operand.hbm [shape: bf16[128,128], index: 1, kind: input, shape index: {}]   ;;  %s627_s2 = inlined_call_operand.hbm [shape: bf16[128,128], index: 2, kind: input, shape index: {}]   ;;  %s628_s3 = inlined_call_operand.vmem [shape: f32[1,128], index: 3, kind: input, shape index: {}]   ;;  %s629_s4 = inlined_call_operand.hbm [shape: f32[1,128], index: 4, kind: input, shape index: {}]   ;;  %s630_s5 = inlined_call_operand.vmem [shape: f32[8,128], index: 5, kind: input, shape index: {}]   ;;  %s631_s6 = inlined_call_operand.hbm [shape: f32[8,128], index: 6, kind: output, shape index: {}]  }
   0x1   :  { %12 = vsyncpa [#allocation7], 0 }
   0x2   :  { %13 = vsyncpa [#allocation10], 0 }
   0x3   :  { %14 = vsyncpa [#allocation5], 0  ;;  %s560_s21 = smov [#allocation6]  }
   0x4   :  { %s30_s22 = sshll.u32 %s560_s21, 4  ;;  %s31_s22 = int_to_ptr.vmem [resolvable:$true] %s30_s22 }
   0x5   :  { %s460_s23 = scalar_lea.vmem %s31_s22, 1024  ;;  %p465_p1 = scmp.lt.s32.totalorder %s31_s22, %s31_s22 }
   0x6   :  { %p461_p0 = scmp.ne.s32.totalorder %s31_s22, %s460_s23  ;;  %p466_p2 = scmp.lt.s32.totalorder %s460_s23, %s460_s23 }
   0x8   :  { %p467_p3 = por %p466_p2, %p465_p1 }
   0xa   :  { %p468_p4 = pnand %p467_p3, %p461_p0 }
   0xc   :  { %471 = shalt.err (!%p468_p4)
}
   0xd   :  { %s561_s24 = smov 64   ;;  %s562_s25 = smov 4  }
   0xe   :  { %36 = dma.hbm_to_vmem [thread:$0]  %s626_s1, 1024, %s31_s22, [#allocation7], %s561_s24, %s561_s24, %s562_s25  }
   0xf   :  { %s563_s28 = smov [#allocation3]   ;;  %s564_s30 = smov [#allocation8]  }
  0x10   :  { %s21_s29 = sshll.u32 %s563_s28, 4  ;;  %s42_s7 = sshll.u32 %s564_s30, 4  ;;  %s22_s29 = int_to_ptr.vmem [resolvable:$true] %s21_s29  ;;  %s43_s7 = int_to_ptr.vmem [resolvable:$true] %s42_s7 }
  0x11   :  { %s480_s8 = scalar_lea.vmem %s22_s29, 128  ;;  %p485_p6 = scmp.lt.s32.totalorder %s22_s29, %s22_s29 }
  0x12   :  { %p481_p5 = scmp.ne.s32.totalorder %s22_s29, %s480_s8  ;;  %p486_p7 = scmp.lt.s32.totalorder %s480_s8, %s480_s8 }
  0x14   :  { %p487_p8 = por %p486_p7, %p485_p6 }
  0x16   :  { %p488_p9 = pnand %p487_p8, %p481_p5 }
  0x18   :  { %491 = shalt.err (!%p488_p9)
}
  0x19   :  { %24 = dma.hbm_to_vmem [thread:$0]  %s625_s0, 128, %s22_s29, [#allocation4]  }
  0x1a   :  { %s500_s11 = scalar_lea.vmem %s43_s7, 1024  ;;  %p505_p11 = scmp.lt.s32.totalorder %s43_s7, %s43_s7 }
  0x1b   :  { %p501_p10 = scmp.ne.s32.totalorder %s43_s7, %s500_s11  ;;  %p506_p12 = scmp.lt.s32.totalorder %s500_s11, %s500_s11 }
  0x1d   :  { %p507_p13 = por %p506_p12, %p505_p11 }
  0x1f   :  { %p508_p0 = pnand %p507_p13, %p501_p10 }
  0x21   :  { %511 = shalt.err (!%p508_p0)
}
  0x22   :  { %48 = dma.hbm_to_vmem [thread:$0]  %s627_s2, 1024, %s43_s7, [#allocation7], %s561_s24, %s561_s24, %s562_s25  }
  0x23   :  { %s565_s13 = smov [#allocation9]  }
  0x24   :  { %s57_s14 = sshll.u32 %s565_s13, 4  ;;  %s58_s14 = int_to_ptr.vmem [resolvable:$true] %s57_s14 }
  0x25   :  { %s520_s15 = scalar_lea.vmem %s58_s14, 16  ;;  %s524_s16 = scalar_lea.vmem %s58_s14, 32 }
  0x26   :  { %p521_p1 = scmp.ne.s32.totalorder %s58_s14, %s520_s15  ;;  %p525_p2 = scmp.lt.s32.totalorder %s58_s14, %s58_s14 }
  0x27   :  { %p526_p3 = scmp.lt.s32.totalorder %s524_s16, %s520_s15 }
  0x29   :  { %p527_p4 = por %p526_p3, %p525_p2 }
  0x2b   :  { %p528_p5 = pnand %p527_p4, %p521_p1 }
  0x2d   :  { %531 = shalt.err (!%p528_p5)
}
  0x2e   :  { %60 = dma.hbm_to_vmem [thread:$0]  %s629_s4, 16, %s58_s14, [#allocation10]  }
  0x2f   :  { %552 = dma.done.wait [#allocation4], 128  }
  0x30   :  { %553 = vsyncadd [#allocation4], 4294967168 }
  0x31   :  { %554 = dma.done.wait [#allocation7], 2048  }
  0x32   :  { %555 = vsyncadd [#allocation7], 4294965248 }
  0x33   :  { %556 = dma.done.wait [#allocation10], 16  }
  0x34   :  { %557 = vsyncadd [#allocation10], 4294967280  ;;  %v566_v0 = vmov 0.0   ;;  %vm567_vm0 = vmmov 0   ;;  %v434_v1 = vld [vmem:[#allocation8 + $0x38] sm:$0xff]   ;;  %v436_v3 = vld [vmem:[#allocation8 + $0x30] sm:$0xff]  }
  0x35   :  { %405 = vmatprep.subr.bf16.mxu1 %v566_v0  ;;  %385 = vmatprep.subr.bf16.mxu0 %v566_v0  ;;  %v435_v2 = vld [vmem:[#allocation6 + $0x38] sm:$0xff]   ;;  %v437_v4 = vld [vmem:[#allocation6 + $0x30] sm:$0xff]   ;;  %v438_v5 = vld [vmem:[#allocation8 + $0x28] sm:$0xff]   ;;  %s568_s20 = smov [#allocation11]  }
  0x36   :  { %421 = vmatprep.mubr.msk.bf16.mxu1 %vm567_vm0, %v566_v0  ;;  %401 = vmatprep.mubr.msk.bf16.mxu0 %vm567_vm0, %v566_v0  ;;  %v439_v6 = vld [vmem:[#allocation6 + $0x28] sm:$0xff]   ;;  %v440_v7 = vld [vmem:[#allocation8 + $0x20] sm:$0xff]   ;;  %v442_v9 = vld [vmem:[#allocation8 + $0x18] sm:$0xff]   ;;  %s338_s21 = sshll.u32 %s568_s20, 4  ;;  %s339_s21 = int_to_ptr.vmem [resolvable:$true] %s338_s21 }
  0x37   :  { %406 = vmatpush3.bf16.msra.mxu1 %v434_v1  ;;  %386 = vmatpush3.bf16.msra.mxu0 %v435_v2  ;;  %v441_v8 = vld [vmem:[#allocation6 + $0x20] sm:$0xff]   ;;  %v443_v10 = vld [vmem:[#allocation6 + $0x18] sm:$0xff]   ;;  %v444_v11 = vld [vmem:[#allocation8 + $0x10] sm:$0xff]   ;;  %s532_s22 = scalar_lea.vmem %s339_s21, 128  ;;  %p537_p7 = scmp.lt.s32.totalorder %s339_s21, %s339_s21 }
  0x38   :  { %407 = vmatprep.subr.bf16.mxu1 %v566_v0  ;;  %387 = vmatprep.subr.bf16.mxu0 %v566_v0  ;;  %v445_v12 = vld [vmem:[#allocation6 + $0x10] sm:$0xff]   ;;  %v446_v13 = vld [vmem:[#allocation8 + $0x8] sm:$0xff]   ;;  %v82_v14 = vld [vmem:[#allocation3] sm:$0xff]  ;;  %p533_p6 = scmp.ne.s32.totalorder %s339_s21, %s532_s22  ;;  %p538_p8 = scmp.lt.s32.totalorder %s532_s22, %s532_s22 }
  0x39   :  { %v447_v15 = vld [vmem:[#allocation6 + $0x8] sm:$0xff]   ;;  %v84_v16 = vmul.f32 %v82_v14, %v82_v14  ;;  %v448_v17 = vld [vmem:[#allocation8] sm:$0xff]   ;;  %v83_v20 = vpack.c.bf16 %v82_v14, %v82_v14  ;;  %v365_v32 = vld [vmem:[%s628_s3] ss:$0 sm:$0xff] }
  0x3a   :  { %v449_v18 = vld [vmem:[#allocation6] sm:$0xff]   ;;  %v321_v34 = vld [vmem:[%s630_s5] sm:$0xff]  ;;  %p539_p9 = por %p538_p8, %p537_p7 }
  0x3b   :  { %408 = vmatpush3.bf16.msra.mxu1 %v436_v3  ;;  %388 = vmatpush3.bf16.msra.mxu0 %v437_v4  ;;  %v85_v19 = vpack.c.bf16 %v84_v16, %v84_v16  ;;  %v366_v21 = vld [vmem:[#allocation9] ss:$0 sm:$0xff] }
  0x3c   :  { %409 = vmatprep.subr.bf16.mxu1 %v566_v0  ;;  %389 = vmatprep.subr.bf16.mxu0 %v566_v0  ;;  %p540_p10 = pnand %p539_p9, %p533_p6 }
  0x3f   :  { %410 = vmatpush3.bf16.msra.mxu1 %v438_v5  ;;  %390 = vmatpush3.bf16.msra.mxu0 %v439_v6 }
  0x40   :  { %411 = vmatprep.subr.bf16.mxu1 %v566_v0  ;;  %391 = vmatprep.subr.bf16.mxu0 %v566_v0 }
  0x43   :  { %412 = vmatpush3.bf16.msra.mxu1 %v440_v7  ;;  %392 = vmatpush3.bf16.msra.mxu0 %v441_v8 }
  0x44   :  { %413 = vmatprep.subr.bf16.mxu1 %v566_v0  ;;  %393 = vmatprep.subr.bf16.mxu0 %v566_v0 }
  0x47   :  { %414 = vmatpush3.bf16.msra.mxu1 %v442_v9  ;;  %394 = vmatpush3.bf16.msra.mxu0 %v443_v10 }
  0x48   :  { %415 = vmatprep.subr.bf16.mxu1 %v566_v0  ;;  %395 = vmatprep.subr.bf16.mxu0 %v566_v0 }
  0x4b   :  { %416 = vmatpush3.bf16.msra.mxu1 %v444_v11  ;;  %396 = vmatpush3.bf16.msra.mxu0 %v445_v12 }
  0x4c   :  { %417 = vmatprep.subr.bf16.mxu1 %v566_v0  ;;  %397 = vmatprep.subr.bf16.mxu0 %v566_v0 }
  0x4f   :  { %418 = vmatpush3.bf16.msra.mxu1 %v446_v13  ;;  %398 = vmatpush3.bf16.msra.mxu0 %v447_v15 }
  0x50   :  { %419 = vmatprep.subr.bf16.mxu1 %v566_v0  ;;  %399 = vmatprep.subr.bf16.mxu0 %v566_v0 }
  0x53   :  { %420 = vmatpush3.bf16.msra.mxu1 %v448_v17  ;;  %400 = vmatpush3.bf16.msra.mxu0 %v449_v18 }
  0x56   :  { %422 = vmatmul.mubr.bf16.vlgmr.msra.gmra.mxu1 %v85_v19  ;;  %402 = vmatmul.mubr.bf16.vlgmr.msra.gmra.mxu0 %v83_v20 }
 0x116   :  { %v292_v22 = vpop.f32.mrf.mxu1  ;;  %v185_v24 = vpop.f32.mrf.mxu0 }
 0x117   :  { %v320_v23 = vadd.f32 %v366_v21, %v292_v22  ;;  %v311_v36 = vadd.f32 %v365_v32, %v185_v24 }
 0x118   :  { %v423_v25 = vpop.f32.mrf.mxu1  ;;  %v403_v26 = vpop.f32.mrf.mxu0 }
 0x119   :  { %450 = vrsqrt.f32 %v320_v23  ;;  %vm324_vm1 = vcmp.eq.f32.partialorder %v320_v23, inf  ;;  %v327_v35 = vand.u32 2147483648, %v320_v23  ;;  %vm326_vm2 = vcmp.eq.f32.partialorder %v320_v23, 0.0 }
 0x11a   :  { %v295_v27 = vpop.f32.mrf.mxu1  ;;  %v188_v28 = vpop.f32.mrf.mxu0 }
 0x11c   :  { %v424_v29 = vpop.f32.mrf.mxu1  ;;  %v404_v30 = vpop.f32.mrf.mxu0 }
 0x126   :  { %v451_v31 = vpop.eup %450 }
 0x127   :  { %v323_v33 = vmul.f32 %v451_v31, %v320_v23 }
 0x129   :  { %v325_v37 = vsel %vm324_vm1, %v320_v23, %v323_v33 }
 0x12a   :  { %v328_v38 = vsel %vm326_vm2, %v327_v35, %v325_v37 }
 0x12b   :  { %v329_v39 = vmul.f32 %v328_v38, %v321_v34 }
 0x12d   :  { %v330_v40 = vadd.f32 %v329_v39, %v311_v36 }
 0x12f   :  { %331 = vst [vmem:[#allocation11] sm:$0xff] %v330_v40 }
 0x130   :  { %543 = shalt.err (!%p540_p10)
}
 0x131   :  { %341 = dma.vmem_to_hbm [thread:$0]  %s339_s21, 128, %s631_s6, [#allocation5]  }
 0x132   :  { %558 = dma.done.wait [#allocation5], 128  }
 0x133   :  { %559 = vsyncadd [#allocation5], 4294967168 }
 0x134   :  { %345 = vsyncpa [#allocation4], 1 }
 0x135   :  { %346 = vsyncpa [#allocation7], 1 }
 0x136   :  { %347 = vsyncpa [#allocation10], 1 }
 0x137   :  { %348 = vsyncpa [#allocation5], 1 }

</bundles_post_ra>
